<compile_context>
chip_gen: v5e
topology: v5e:2x2
jax: 0.10.0
libtpu: 0.0.40
codegen_flags: <defaults>
</compile_context>

<pallas_src>
import functools

import jax
import jax.numpy as jnp
from jax.experimental import pallas as pl
from jax.experimental.pallas import tpu as pltpu

LANE = 128      # lane width of a vreg
SUBLANE = 8     # sublane count of a vreg


def _round_up(n, m):
    return ((n + m - 1) // m) * m


def decoder_kernel(x_ref, w1_ref, b1_ref, w2_ref, b2_ref, w3_ref, b3_ref, out_ref):
    x = x_ref[...]                                           # (TB, L) f32

    # FC_hidden + LeakyReLU(0.2) -- bf16 MXU operands, f32 accumulate/elementwise.
    h = jnp.dot(x.astype(jnp.bfloat16), w1_ref[...],
                preferred_element_type=jnp.float32) + b1_ref[...]
    h = jnp.maximum(h, 0.2 * h)

    # FC_hidden2 + LeakyReLU(0.2)
    h = jnp.dot(h.astype(jnp.bfloat16), w2_ref[...],
                preferred_element_type=jnp.float32) + b2_ref[...]
    h = jnp.maximum(h, 0.2 * h)

    # FC_output + sigmoid (exp on EUP, approx reciprocal on EUP)
    y = jnp.dot(h.astype(jnp.bfloat16), w3_ref[...],
                preferred_element_type=jnp.float32) + b3_ref[...]
    e = jnp.exp(-y)
    out_ref[...] = pl.reciprocal(1.0 + e, approx=True).astype(out_ref.dtype)


def prepare_params(params):
    """One-time prep: pad hidden (lane) dim to 128, cast weights to bf16.

    Input weights are (in_features, out_features), biases (1, out_features).
    Latent (x's lane dim) and output dims are left at their real widths so the
    kernel's streamed input/output blocks carry no padding bytes.
    """
    L, H = params["w1"].shape
    O = params["w3"].shape[1]
    Hp = _round_up(H, LANE)

    def pad2(a, rows, cols, dtype):
        return jnp.pad(a, ((0, rows - a.shape[0]), (0, cols - a.shape[1]))).astype(dtype)

    return dict(
        w1=pad2(params["w1"], L,  Hp, jnp.bfloat16),
        b1=pad2(params["b1"], 1,  Hp, jnp.float32),
        w2=pad2(params["w2"], Hp, Hp, jnp.bfloat16),
        b2=pad2(params["b2"], 1,  Hp, jnp.float32),
        w3=pad2(params["w3"], Hp, O,  jnp.bfloat16),
        b3=pad2(params["b3"], 1,  O,  jnp.float32),
    )


@functools.partial(jax.jit, static_argnames=("block_batch",))
def decoder_forward(x, prepped, *, block_batch=512):
    """x: (B, latent_dim) f32. prepped: output of prepare_params()."""
    B, L = x.shape
    Hp = prepped["w1"].shape[1]
    O = prepped["w3"].shape[1]

    # Batch tiling: single block for small batches; large, even-count tiles otherwise.
    if B <= 256:
        TB = _round_up(max(B, SUBLANE), SUBLANE)
        Bp = TB
    else:
        TB = _round_up(min(block_batch, 512), SUBLANE)
        steps = pl.cdiv(B, TB)
        if steps > 1 and steps % 2 == 1:
            steps += 1                       # even grid -> balanced across v7x's 2 TCs
        Bp = steps * TB
    grid = (Bp // TB,)

    xp = x.astype(jnp.float32)
    if Bp != B:
        xp = jnp.pad(xp, ((0, Bp - B), (0, 0)))

    # Weights/biases: constant index_map -> fetched once, VMEM-resident across grid.
    def const(shape):
        return pl.BlockSpec(shape, lambda i: (0, 0))

    flops = 2 * Bp * (L * Hp + Hp * Hp + Hp * O)
    bytes_accessed = (4 * Bp * (L + O)                         # streamed x / out (f32)
                      + 2 * (L * Hp + Hp * Hp + Hp * O)        # bf16 weights
                      + 4 * (2 * Hp + O))                      # f32 biases

    # VMEM: resident weights/biases once + double-buffered x/out tiles + margin.
    weight_bytes = 2 * (L * Hp + Hp * Hp + Hp * O) + 4 * (2 * Hp + O)
    io_bytes = 2 * 4 * TB * (L + O)
    vmem_budget = int(min(max(weight_bytes + io_bytes + (4 << 20), 8 << 20), 32 << 20))

    out = pl.pallas_call(
        decoder_kernel,
        out_shape=jax.ShapeDtypeStruct((Bp, O), jnp.float32),
        grid=grid,
        in_specs=[
            pl.BlockSpec((TB, L), lambda i: (i, 0)),  # x streamed at real latent width
            const((L, Hp)),  const((1, Hp)),          # FC_hidden
            const((Hp, Hp)), const((1, Hp)),          # FC_hidden2
            const((Hp, O)),  const((1, O)),           # FC_output
        ],
        out_specs=pl.BlockSpec((TB, O), lambda i: (i, 0)),     # real output width
        compiler_params=pltpu.CompilerParams(
            dimension_semantics=("parallel",),
            vmem_limit_bytes=vmem_budget,
        ),
        cost_estimate=pl.CostEstimate(
            flops=flops,
            transcendentals=2 * Bp * O,               # exp + reciprocal per output
            bytes_accessed=bytes_accessed,
        ),
    )(xp, prepped["w1"], prepped["b1"], prepped["w2"], prepped["b2"],
      prepped["w3"], prepped["b3"])

    return out[:B]


def make_params(key, latent_dim, hidden_dim, output_dim):
    """Deterministic synthetic init (PyTorch-Linear-like uniform fan-in scaling).
    Weights are stored as (in_features, out_features), biases (1, out_features)."""
    def linear(k, fan_in, fan_out):
        kw, kb = jax.random.split(k)
        bound = 1.0 / jnp.sqrt(fan_in)
        w = jax.random.uniform(kw, (fan_in, fan_out), jnp.float32, -bound, bound)
        b = jax.random.uniform(kb, (1, fan_out), jnp.float32, -bound, bound)
        return w, b

    k1, k2, k3 = jax.random.split(key, 3)
    w1, b1 = linear(k1, latent_dim, hidden_dim)
    w2, b2 = linear(k2, hidden_dim, hidden_dim)
    w3, b3 = linear(k3, hidden_dim, output_dim)
    return dict(w1=w1, b1=b1, w2=w2, b2=b2, w3=w3, b3=b3)


def decoder_ref(x, p):
    """Pure-JAX f32 reference matching the PyTorch forward."""
    lrelu = lambda t: jnp.where(t > 0, t, 0.2 * t)
    h = lrelu(x @ p["w1"] + p["b1"])
    h = lrelu(h @ p["w2"] + p["b2"])
    y = h @ p["w3"] + p["b3"]
    return 1.0 / (1.0 + jnp.exp(-y))


if __name__ == "__main__":
    # Small shapes consistent with the module: x is (batch, latent_dim).
    batch, latent_dim, hidden_dim, output_dim = 32, 16, 32, 64

    key = jax.random.PRNGKey(0)
    kx, kp = jax.random.split(key)
    x = jax.random.normal(kx, (batch, latent_dim), jnp.float32)
    params = make_params(kp, latent_dim, hidden_dim, output_dim)

    # One-time weight padding / bf16 cast, hoisted out of the jitted forward.
    prepped = prepare_params(params)

    # batch=32 <= 256 -> single block, grid=(1,).
    x_hat = decoder_forward(x, prepped)
    jax.block_until_ready(x_hat)

    x_hat_ref = decoder_ref(x, params)
    assert x_hat.shape == (batch, output_dim)
    # bf16 MXU operands + approx reciprocal -> compare with a loose tolerance.
    assert jnp.allclose(x_hat, x_hat_ref, atol=2e-2), float(
        jnp.max(jnp.abs(x_hat - x_hat_ref)))

    print("KERNEL_OK")
</pallas_src>

<mosaic_0001>
module attributes {stable_mosaic.version = 11 : i64} {
  func.func @decoder_kernel(%arg0: i32, %arg1: memref<32x16xf32, #tpu.memory_space<vmem>>, %arg2: memref<16x128xbf16, #tpu.memory_space<vmem>>, %arg3: memref<1x128xf32, #tpu.memory_space<vmem>>, %arg4: memref<128x128xbf16, #tpu.memory_space<vmem>>, %arg5: memref<1x128xf32, #tpu.memory_space<vmem>>, %arg6: memref<128x64xbf16, #tpu.memory_space<vmem>>, %arg7: memref<1x64xf32, #tpu.memory_space<vmem>>, %arg8: memref<32x64xf32, #tpu.memory_space<vmem>>) attributes {dimension_semantics = [#tpu.dimension_semantics<parallel>], iteration_bounds = array<i64: 1>, scalar_prefetch = 0 : i64, scratch_operands = 0 : i64, tpu.core_type = #tpu.core_type<tc>, window_params = [{transform_indices = @transform_0, window_bounds = array<i64: 32, 16>}, {pipeline_mode = #tpu.pipeline_mode<synchronous>, transform_indices = @transform_1, window_bounds = array<i64: 16, 128>}, {pipeline_mode = #tpu.pipeline_mode<synchronous>, transform_indices = @transform_2, window_bounds = array<i64: 1, 128>}, {pipeline_mode = #tpu.pipeline_mode<synchronous>, transform_indices = @transform_3, window_bounds = array<i64: 128, 128>}, {pipeline_mode = #tpu.pipeline_mode<synchronous>, transform_indices = @transform_4, window_bounds = array<i64: 1, 128>}, {pipeline_mode = #tpu.pipeline_mode<synchronous>, transform_indices = @transform_5, window_bounds = array<i64: 128, 64>}, {pipeline_mode = #tpu.pipeline_mode<synchronous>, transform_indices = @transform_6, window_bounds = array<i64: 1, 64>}, {transform_indices = @transform_7, window_bounds = array<i64: 32, 64>}]} {
    %c0 = arith.constant 0 : index
    %c0_0 = arith.constant 0 : index
    %0 = vector.load %arg1[%c0, %c0_0] : memref<32x16xf32, #tpu.memory_space<vmem>>, vector<32x16xf32>
    %1 = arith.truncf %0 : vector<32x16xf32> to vector<32x16xbf16>
    %c0_1 = arith.constant 0 : index
    %c0_2 = arith.constant 0 : index
    %2 = vector.load %arg2[%c0_1, %c0_2] : memref<16x128xbf16, #tpu.memory_space<vmem>>, vector<16x128xbf16>
    %cst = arith.constant dense<0.000000e+00> : vector<32x128xf32>
    %3 = tpu.matmul %1, %2, %cst {dimension_numbers = #tpu.dot_dimension_numbers<[1], [0], [0], [1], [0, 0, 1, 1], [], []>} : vector<32x16xbf16>, vector<16x128xbf16>, vector<32x128xf32> -> vector<32x128xf32>
    %c0_3 = arith.constant 0 : index
    %c0_4 = arith.constant 0 : index
    %4 = vector.load %arg3[%c0_3, %c0_4] : memref<1x128xf32, #tpu.memory_space<vmem>>, vector<1x128xf32>
    %5 = vector.broadcast %4 : vector<1x128xf32> to vector<32x128xf32>
    %6 = arith.addf %3, %5 : vector<32x128xf32>
    %cst_5 = arith.constant 2.000000e-01 : f32
    %7 = vector.broadcast %cst_5 : f32 to vector<32x128xf32>
    %8 = arith.mulf %7, %6 : vector<32x128xf32>
    %9 = arith.maximumf %6, %8 : vector<32x128xf32>
    %10 = arith.truncf %9 : vector<32x128xf32> to vector<32x128xbf16>
    %c0_6 = arith.constant 0 : index
    %c0_7 = arith.constant 0 : index
    %11 = vector.load %arg4[%c0_6, %c0_7] : memref<128x128xbf16, #tpu.memory_space<vmem>>, vector<128x128xbf16>
    %cst_8 = arith.constant dense<0.000000e+00> : vector<32x128xf32>
    %12 = tpu.matmul %10, %11, %cst_8 {dimension_numbers = #tpu.dot_dimension_numbers<[1], [0], [0], [1], [0, 0, 1, 1], [], []>} : vector<32x128xbf16>, vector<128x128xbf16>, vector<32x128xf32> -> vector<32x128xf32>
    %c0_9 = arith.constant 0 : index
    %c0_10 = arith.constant 0 : index
    %13 = vector.load %arg5[%c0_9, %c0_10] : memref<1x128xf32, #tpu.memory_space<vmem>>, vector<1x128xf32>
    %14 = vector.broadcast %13 : vector<1x128xf32> to vector<32x128xf32>
    %15 = arith.addf %12, %14 : vector<32x128xf32>
    %cst_11 = arith.constant 2.000000e-01 : f32
    %16 = vector.broadcast %cst_11 : f32 to vector<32x128xf32>
    %17 = arith.mulf %16, %15 : vector<32x128xf32>
    %18 = arith.maximumf %15, %17 : vector<32x128xf32>
    %19 = arith.truncf %18 : vector<32x128xf32> to vector<32x128xbf16>
    %c0_12 = arith.constant 0 : index
    %c0_13 = arith.constant 0 : index
    %20 = vector.load %arg6[%c0_12, %c0_13] : memref<128x64xbf16, #tpu.memory_space<vmem>>, vector<128x64xbf16>
    %cst_14 = arith.constant dense<0.000000e+00> : vector<32x64xf32>
    %21 = tpu.matmul %19, %20, %cst_14 {dimension_numbers = #tpu.dot_dimension_numbers<[1], [0], [0], [1], [0, 0, 1, 1], [], []>} : vector<32x128xbf16>, vector<128x64xbf16>, vector<32x64xf32> -> vector<32x64xf32>
    %c0_15 = arith.constant 0 : index
    %c0_16 = arith.constant 0 : index
    %22 = vector.load %arg7[%c0_15, %c0_16] : memref<1x64xf32, #tpu.memory_space<vmem>>, vector<1x64xf32>
    %23 = vector.broadcast %22 : vector<1x64xf32> to vector<32x64xf32>
    %24 = arith.addf %21, %23 : vector<32x64xf32>
    %cst_17 = arith.constant 0.000000e+00 : f32
    %25 = vector.broadcast %cst_17 : f32 to vector<32x64xf32>
    %26 = arith.subf %25, %24 : vector<32x64xf32>
    %27 = math.exp %26 : vector<32x64xf32>
    %cst_18 = arith.constant 1.000000e+00 : f32
    %28 = vector.broadcast %cst_18 : f32 to vector<32x64xf32>
    %29 = arith.addf %28, %27 : vector<32x64xf32>
    %30 = tpu.reciprocal %29 {approx = true} : vector<32x64xf32> -> vector<32x64xf32>
    %c0_19 = arith.constant 0 : index
    %c0_20 = arith.constant 0 : index
    %31 = vector.load %arg8[%c0_19, %c0_20] : memref<32x64xf32, #tpu.memory_space<vmem>>, vector<32x64xf32>
    tpu.vector_store %arg8[%c0_19, %c0_20], %30 {strides = array<i32>} : memref<32x64xf32, #tpu.memory_space<vmem>>, vector<32x64xf32>,
    return
  }
  func.func @transform_0(%arg0: i32) -> (i32, i32) {
    %c0_i32 = arith.constant 0 : i32
    %c0_i32_0 = arith.constant 0 : i32
    return %arg0, %c0_i32 : i32, i32
  }
  func.func @transform_1(%arg0: i32) -> (i32, i32) {
    %c0_i32 = arith.constant 0 : i32
    %c0_i32_0 = arith.constant 0 : i32
    %c0_i32_1 = arith.constant 0 : i32
    return %c0_i32, %c0_i32_0 : i32, i32
  }
  func.func @transform_2(%arg0: i32) -> (i32, i32) {
    %c0_i32 = arith.constant 0 : i32
    %c0_i32_0 = arith.constant 0 : i32
    %c0_i32_1 = arith.constant 0 : i32
    return %c0_i32, %c0_i32_0 : i32, i32
  }
  func.func @transform_3(%arg0: i32) -> (i32, i32) {
    %c0_i32 = arith.constant 0 : i32
    %c0_i32_0 = arith.constant 0 : i32
    %c0_i32_1 = arith.constant 0 : i32
    return %c0_i32, %c0_i32_0 : i32, i32
  }
  func.func @transform_4(%arg0: i32) -> (i32, i32) {
    %c0_i32 = arith.constant 0 : i32
    %c0_i32_0 = arith.constant 0 : i32
    %c0_i32_1 = arith.constant 0 : i32
    return %c0_i32, %c0_i32_0 : i32, i32
  }
  func.func @transform_5(%arg0: i32) -> (i32, i32) {
    %c0_i32 = arith.constant 0 : i32
    %c0_i32_0 = arith.constant 0 : i32
    %c0_i32_1 = arith.constant 0 : i32
    return %c0_i32, %c0_i32_0 : i32, i32
  }
  func.func @transform_6(%arg0: i32) -> (i32, i32) {
    %c0_i32 = arith.constant 0 : i32
    %c0_i32_0 = arith.constant 0 : i32
    %c0_i32_1 = arith.constant 0 : i32
    return %c0_i32, %c0_i32_0 : i32, i32
  }
  func.func @transform_7(%arg0: i32) -> (i32, i32) {
    %c0_i32 = arith.constant 0 : i32
    %c0_i32_0 = arith.constant 0 : i32
    return %arg0, %c0_i32 : i32, i32
  }
}

</mosaic_0001>

<bundles_post_ra>
// kernel: decoder_forward.1
= control target key start
LH: loop header
LB: loop body
LE: loop exit
PB: predicated region body
PF: predicated region fallthrough
CT: control target
= control target key end

     0   :  { %vm46_vm0 = vcmask 130048   ;;  %s584_s0 = inlined_call_operand.vmem [shape: f32[32,16], index: 0, kind: input, shape index: {}]   ;;  %s585_s1 = inlined_call_operand.vmem [shape: bf16[16,128], index: 1, kind: input, shape index: {}]   ;;  %s586_s2 = inlined_call_operand.vmem [shape: f32[1,128], index: 2, kind: input, shape index: {}]   ;;  %s587_s3 = inlined_call_operand.vmem [shape: bf16[128,128], index: 3, kind: input, shape index: {}]   ;;  %s588_s4 = inlined_call_operand.vmem [shape: f32[1,128], index: 4, kind: input, shape index: {}]   ;;  %s589_s5 = inlined_call_operand.vmem [shape: bf16[128,64], index: 5, kind: input, shape index: {}]   ;;  %s590_s6 = inlined_call_operand.vmem [shape: f32[1,64], index: 6, kind: input, shape index: {}]   ;;  %s591_s7 = inlined_call_operand.hbm [shape: f32[32,64], index: 7, kind: output, shape index: {}]  }
   0x1   :  { %v379_v0 = vld [vmem:[%s585_s1] sm:$0xff]  ;;  %v29_v2 = vld [vmem:[%s584_s0 + $0x8] sm:$0xff]  ;;  %v387_v4 = vld [vmem:[%s587_s3 + $0x38] sm:$0xff] }
   0x2   :  { %v28_v1 = vld [vmem:[%s584_s0] sm:$0xff]  ;;  %60 = vmatpush.bf16.msra.mxu0 %v379_v0  ;;  %150 = vmatpush.bf16.msra.mxu1 %v387_v4  ;;  %v386_v5 = vld [vmem:[%s587_s3 + $0x30] sm:$0xff] }
   0x3   :  { %v32_v3 = vpack.c.bf16 %v29_v2, %v28_v1  ;;  %396 = vmatpush.bf16.msra.mxu3 %v387_v4 }
   0x4   :  { %12 = vsyncpa [#allocation3], 0  ;;  %v385_v6 = vld [vmem:[%s587_s3 + $0x28] sm:$0xff]  ;;  %v384_v7 = vld [vmem:[%s587_s3 + $0x20] sm:$0xff]  ;;  %vm286_vm1 = vcmask 523264   ;;  %s297_s22 = sshll.u32 %s591_s7, 4  ;;  %s298_s22 = int_to_ptr.hbm [resolvable:$true] %s297_s22 }
   0x5   :  { %313 = vmatmul.msk.bf16.vlgmr.msra.gmra.mxu0 %vm46_vm0, %v32_v3  ;;  %v30_v8 = vld [vmem:[%s584_s0 + $0x10] sm:$0xff]  ;;  %v31_v9 = vld [vmem:[%s584_s0 + $0x18] sm:$0xff]  ;;  %v381_v13 = vld [vmem:[%s587_s3 + $0x8] sm:$0xff]  ;;  %s461_s23 = smov 128   ;;  %s462_s0 = smov 8  }
   0x6   :  { %151 = vmatpush.bf16.msra.mxu1 %v386_v5  ;;  %v33_v10 = vpack.c.bf16 %v31_v9, %v30_v8  ;;  %v383_v11 = vld [vmem:[%s587_s3 + $0x18] sm:$0xff]  ;;  %v382_v12 = vld [vmem:[%s587_s3 + $0x10] sm:$0xff]  ;;  %v380_v14 = vld [vmem:[%s587_s3] sm:$0xff] }
   0x7   :  { %397 = vmatpush.bf16.msra.mxu3 %v386_v5  ;;  %v415_v16 = vld [vmem:[%s586_s2] ss:$0 sm:$0xff]  ;;  %v395_v17 = vld [vmem:[%s589_s5 + $0x38] sm:$0xff]  ;;  %v394_v18 = vld [vmem:[%s589_s5 + $0x30] sm:$0xff] }
   0x8   :  { %247 = vmatpush.bf16.msrb.mxu0 %v395_v17  ;;  %404 = vmatpush.bf16.msra.mxu2 %v395_v17  ;;  %v393_v20 = vld [vmem:[%s589_s5 + $0x28] sm:$0xff]  ;;  %v392_v25 = vld [vmem:[%s589_s5 + $0x20] sm:$0xff]  ;;  %v391_v38 = vld [vmem:[%s589_s5 + $0x18] sm:$0xff] }
   0x9   :  { %v390_v39 = vld [vmem:[%s589_s5 + $0x10] sm:$0xff]  ;;  %v389_v40 = vld [vmem:[%s589_s5 + $0x8] sm:$0xff]  ;;  %v388_v41 = vld [vmem:[%s589_s5] sm:$0xff] }
   0xa   :  { %152 = vmatpush.bf16.msra.mxu1 %v385_v6  ;;  %v416_v43 = vld [vmem:[%s588_s4] ss:$0 sm:$0xff] }
   0xb   :  { %398 = vmatpush.bf16.msra.mxu3 %v385_v6  ;;  %v417_v61 = vld [vmem:[%s590_s6] ss:$0 sm:$0xff]  ;;  %s460_s6 = smov [#allocation2]  }
   0xc   :  { %248 = vmatpush.bf16.msrb.mxu0 %v394_v18  ;;  %405 = vmatpush.bf16.msra.mxu2 %v394_v18  ;;  %s295_s19 = sshll.u32 %s460_s6, 4  ;;  %s296_s19 = int_to_ptr.vmem [resolvable:$true] %s295_s19 }
   0xe   :  { %153 = vmatpush.bf16.msra.mxu1 %v384_v7 }
   0xf   :  { %399 = vmatpush.bf16.msra.mxu3 %v384_v7 }
  0x10   :  { %249 = vmatpush.bf16.msrb.mxu0 %v393_v20  ;;  %406 = vmatpush.bf16.msra.mxu2 %v393_v20 }
  0x12   :  { %154 = vmatpush.bf16.msra.mxu1 %v383_v11 }
  0x13   :  { %400 = vmatpush.bf16.msra.mxu3 %v383_v11 }
  0x14   :  { %250 = vmatpush.bf16.msrb.mxu0 %v392_v25  ;;  %407 = vmatpush.bf16.msra.mxu2 %v392_v25 }
  0x15   :  { %314 = vmatmul.msk.bf16.gmra.mxu0 %vm46_vm0, %v33_v10 }
  0x16   :  { %155 = vmatpush.bf16.msra.mxu1 %v382_v12 }
  0x17   :  { %401 = vmatpush.bf16.msra.mxu3 %v382_v12 }
  0x18   :  { %251 = vmatpush.bf16.msrb.mxu0 %v391_v38  ;;  %408 = vmatpush.bf16.msra.mxu2 %v391_v38 }
  0x1a   :  { %156 = vmatpush.bf16.msra.mxu1 %v381_v13 }
  0x1b   :  { %402 = vmatpush.bf16.msra.mxu3 %v381_v13 }
  0x1c   :  { %252 = vmatpush.bf16.msrb.mxu0 %v390_v39  ;;  %409 = vmatpush.bf16.msra.mxu2 %v390_v39 }
  0x1e   :  { %157 = vmatpush.bf16.msra.mxu1 %v380_v14 }
  0x1f   :  { %403 = vmatpush.bf16.msra.mxu3 %v380_v14 }
  0x20   :  { %253 = vmatpush.bf16.msrb.mxu0 %v389_v40  ;;  %410 = vmatpush.bf16.msra.mxu2 %v389_v40 }
  0x24   :  { %254 = vmatpush.bf16.msrb.mxu0 %v388_v41  ;;  %411 = vmatpush.bf16.msra.mxu2 %v388_v41 }
  0x82   :  { %v62_v15 = vpop.f32.mrf.mxu0 }
  0x83   :  { %v63_v19 = vadd.f32 %v415_v16, %v62_v15 }
  0x85   :  { %v72_v22 = vmul.f32 0.2, %v63_v19 }
  0x87   :  { %v76_v26 = vmax.f32 %v63_v19, %v72_v22 }
  0x8a   :  { %v64_v21 = vpop.f32.mrf.mxu0 }
  0x8b   :  { %v65_v23 = vadd.f32 %v415_v16, %v64_v21 }
  0x8d   :  { %v73_v24 = vmul.f32 0.2, %v65_v23 }
  0x8f   :  { %v77_v27 = vmax.f32 %v65_v23, %v73_v24 }
  0x91   :  { %v80_v28 = vpack.c.bf16 %v77_v27, %v76_v26 }
  0x92   :  { %v67_v29 = vpop.f32.mrf.mxu0 }
  0x93   :  { %158 = vmatmul.bf16.vlgmr.msra.gmra.mxu1 %v80_v28  ;;  %v68_v30 = vadd.f32 %v415_v16, %v67_v29 }
  0x95   :  { %v74_v32 = vmul.f32 0.2, %v68_v30 }
  0x97   :  { %v78_v35 = vmax.f32 %v68_v30, %v74_v32 }
  0x9a   :  { %v69_v31 = vpop.f32.mrf.mxu0 }
  0x9b   :  { %v70_v33 = vadd.f32 %v415_v16, %v69_v31 }
  0x9d   :  { %v75_v34 = vmul.f32 0.2, %v70_v33 }
  0x9f   :  { %v79_v36 = vmax.f32 %v70_v33, %v75_v34 }
  0xa1   :  { %v81_v37 = vpack.c.bf16 %v79_v36, %v78_v35 }
  0xa3   :  { %163 = vmatmul.bf16.vlgmr.msra.gmra.mxu3 %v81_v37 }
 0x110   :  { %v159_v42 = vpop.f32.mrf.mxu1 }
 0x111   :  { %v160_v44 = vadd.f32 %v416_v43, %v159_v42 }
 0x113   :  { %v169_v46 = vmul.f32 0.2, %v160_v44 }
 0x115   :  { %v173_v49 = vmax.f32 %v160_v44, %v169_v46 }
 0x118   :  { %v161_v45 = vpop.f32.mrf.mxu1 }
 0x119   :  { %v162_v47 = vadd.f32 %v416_v43, %v161_v45 }
 0x11b   :  { %v170_v48 = vmul.f32 0.2, %v162_v47 }
 0x11d   :  { %v174_v50 = vmax.f32 %v162_v47, %v170_v48 }
 0x11f   :  { %v177_v51 = vpack.c.bf16 %v174_v50, %v173_v49 }
 0x121   :  { %255 = vmatmul.bf16.vlgmr.msrb.gmra.mxu0 %v177_v51 }
 0x126   :  { %v164_v52 = vpop.f32.mrf.mxu3 }
 0x127   :  { %v165_v53 = vadd.f32 %v416_v43, %v164_v52 }
 0x129   :  { %v171_v55 = vmul.f32 0.2, %v165_v53 }
 0x12b   :  { %v175_v58 = vmax.f32 %v165_v53, %v171_v55 }
 0x12e   :  { %v166_v54 = vpop.f32.mrf.mxu3 }
 0x12f   :  { %v167_v56 = vadd.f32 %v416_v43, %v166_v54 }
 0x131   :  { %v172_v57 = vmul.f32 0.2, %v167_v56 }
 0x133   :  { %v176_v59 = vmax.f32 %v167_v56, %v172_v57 }
 0x135   :  { %v178_v60 = vpack.c.bf16 %v176_v59, %v175_v58 }
 0x137   :  { %260 = vmatmul.bf16.vlgmr.msra.gmra.mxu2 %v178_v60 }
 0x19e   :  { %v256_v62 = vpop.f32.mrf.mxu0 }
 0x19f   :  { %v257_v63 = vadd.f32 %v417_v61, %v256_v62 }
 0x1a1   :  { %v266_v0 = vsub.f32 0.0, %v257_v63 }
 0x1a3   :  { %v270_v1 = vmul.f32 1.442695, %v266_v0 }
 0x1a5   :  { %418 = vpow2.f32 %v270_v1 }
 0x1a6   :  { %v258_v2 = vpop.f32.mrf.mxu0 }
 0x1a7   :  { %v259_v3 = vadd.f32 %v417_v61, %v258_v2 }
 0x1a9   :  { %v267_v4 = vsub.f32 0.0, %v259_v3 }
 0x1ab   :  { %v419_v5 = vpop.eup %418  ;;  %v272_v6 = vmul.f32 1.442695, %v267_v4 }
 0x1ac   :  { %v278_v7 = vadd.f32 1.0, %v419_v5 }
 0x1ad   :  { %420 = vpow2.f32 %v272_v6 }
 0x1ae   :  { %422 = vrcp.f32 %v278_v7 }
 0x1b3   :  { %v421_v8 = vpop.eup %420 }
 0x1b4   :  { %v423_v9 = vpop.eup %422  ;;  %v279_v10 = vadd.f32 1.0, %v421_v8 }
 0x1b5   :  { %287 = vst.msk [vmem:[#allocation2] sm:$0xff] %vm286_vm1, %v423_v9 }
 0x1b6   :  { %424 = vrcp.f32 %v279_v10 }
 0x1ba   :  { %v261_v11 = vpop.f32.mrf.mxu2 }
 0x1bb   :  { %v262_v12 = vadd.f32 %v417_v61, %v261_v11 }
 0x1bc   :  { %v425_v13 = vpop.eup %424 }
 0x1bd   :  { %288 = vst.msk [vmem:[#allocation2 + $0x8] sm:$0xff] %vm286_vm1, %v425_v13  ;;  %v268_v14 = vsub.f32 0.0, %v262_v12 }
 0x1bf   :  { %v274_v15 = vmul.f32 1.442695, %v268_v14 }
 0x1c1   :  { %426 = vpow2.f32 %v274_v15 }
 0x1c2   :  { %v263_v16 = vpop.f32.mrf.mxu2 }
 0x1c3   :  { %v264_v17 = vadd.f32 %v417_v61, %v263_v16 }
 0x1c5   :  { %v269_v18 = vsub.f32 0.0, %v264_v17 }
 0x1c7   :  { %v427_v19 = vpop.eup %426  ;;  %v276_v20 = vmul.f32 1.442695, %v269_v18 }
 0x1c8   :  { %v280_v21 = vadd.f32 1.0, %v427_v19 }
 0x1c9   :  { %428 = vpow2.f32 %v276_v20 }
 0x1ca   :  { %430 = vrcp.f32 %v280_v21 }
 0x1cf   :  { %v429_v22 = vpop.eup %428 }
 0x1d0   :  { %v431_v23 = vpop.eup %430  ;;  %v281_v24 = vadd.f32 1.0, %v429_v22 }
 0x1d1   :  { %289 = vst.msk [vmem:[#allocation2 + $0x10] sm:$0xff] %vm286_vm1, %v431_v23 }
 0x1d2   :  { %432 = vrcp.f32 %v281_v24 }
 0x1d8   :  { %v433_v25 = vpop.eup %432 }
 0x1d9   :  { %290 = vst.msk [vmem:[#allocation2 + $0x18] sm:$0xff] %vm286_vm1, %v433_v25 }
 0x1da   :  { %303 = dma.vmem_to_hbm [thread:$0]  %s296_s19, 512, %s298_s22, [#allocation3], %s461_s23, %s461_s23, %s462_s0  }
 0x1db   :  { %458 = dma.done.wait [#allocation3], 512  }
 0x1dc   :  { %459 = vsyncadd [#allocation3], 4294966784 }
 0x1dd   :  { %308 = vsyncpa [#allocation3], 1 }

</bundles_post_ra>
